<compile_context>
chip_gen: v6e
topology: v6e:2x2x1
jax: 0.10.0
libtpu: 0.0.40
codegen_flags: <defaults>
</compile_context>

<pallas_src>
import functools
import math

import jax
import jax.numpy as jnp
from jax.experimental import pallas as pl
from jax.experimental.pallas import tpu as pltpu


_INV_SQRT_2 = 1.0 / math.sqrt(2.0)
_SQRT_2_OVER_PI = math.sqrt(2.0 / math.pi)


def _gelu(x, approximate):
    if approximate:
        # tanh-based GELU: tanh lowers to the EUP slot and overlaps MXU/VPU
        # work.  Slightly different numerics from nn.GELU()'s exact erf.
        inner = _SQRT_2_OVER_PI * (x + 0.044715 * (x * x * x))
        return 0.5 * x * (1.0 + jnp.tanh(inner))
    # Exact erf-based GELU — matches PyTorch nn.GELU() default.
    return 0.5 * x * (1.0 + jax.lax.erf(x * _INV_SQRT_2))


def _mlp_kernel(x_ref, w1_ref, b1_ref, w2_ref, b2_ref, o_ref, *,
                approximate_gelu):
    # x_ref:  (C_in, T)          channel-major spatial tile, native dtype
    # w1_ref: (C_hidden, C_in)   bf16 (or f32)
    # b1_ref: (C_hidden, 1)      f32
    # w2_ref: (C_out, C_hidden)  bf16 (or f32)
    # b2_ref: (C_out, 1)         f32
    # o_ref:  (C_out, T)
    mxu_dtype = w1_ref.dtype

    # Cast x to the MXU operand dtype in-kernel (cheap pack over a (C_in, T)
    # slab) instead of a separate wrapper-side HBM convert pass.
    x = x_ref[...]
    if x.dtype != mxu_dtype:
        x = x.astype(mxu_dtype)

    # First 1x1 conv: MXU matmul with f32 accumulation; bias fused as epilogue.
    h = jnp.dot(w1_ref[...], x, preferred_element_type=jnp.float32)
    h = h + b1_ref[...]                                   # (C_hidden, T) f32

    g = _gelu(h, approximate_gelu)                        # f32

    # Second 1x1 conv: cast the activation to the MXU dtype for a single-pass
    # vmatmul (f32 x f32 would need multi-pass emulation).
    g = g.astype(mxu_dtype)
    o = jnp.dot(w2_ref[...], g, preferred_element_type=jnp.float32)
    o = o + b2_ref[...]                                   # (C_out, T) f32

    o_ref[...] = o.astype(o_ref.dtype)


def mlp_pallas(x_nchw, w1, b1, w2, b2, *, tile_hw=8192,
               mxu_dtype=jnp.bfloat16, approximate_gelu=False):
    """Forward of the 1x1-conv MLP (matches the PyTorch module, dropout=0).

    x_nchw: (B, C_in, H, W)           streamed in its native dtype
    w1:     (C_hidden, C_in, 1, 1)    PyTorch conv weight layout
    b1:     (C_hidden,)
    w2:     (C_out, C_hidden, 1, 1)
    b2:     (C_out,)
    returns (B, C_out, H, W) with x_nchw.dtype
    """
    B, C_in, H, W = x_nchw.shape
    C_hidden = w1.shape[0]
    C_out = w2.shape[0]
    hw = H * W
    out_dtype = x_nchw.dtype

    if mxu_dtype is None:
        mxu_dtype = jnp.float32

    # NCHW -> (B, C_in, H*W): contiguous reshape, no transpose / HBM shuffle,
    # and crucially NO dtype cast (that would be an extra HBM pass).
    x_cm = x_nchw.reshape(B, C_in, hw)

    # Conv weights (O, I, 1, 1) -> (O, I): already the orientation needed for
    # out[o, t] = sum_i w[o, i] * x[i, t].  Weights are tiny, so the one-time
    # cast to the MXU operand dtype is negligible.  Biases stay f32 columns.
    w1_m = w1.reshape(C_hidden, C_in).astype(mxu_dtype)
    w2_m = w2.reshape(C_out, C_hidden).astype(mxu_dtype)
    b1_m = b1.reshape(C_hidden, 1).astype(jnp.float32)
    b2_m = b2.reshape(C_out, 1).astype(jnp.float32)

    # Spatial tile: a multiple of 128 lanes, or the full spatial extent if it
    # is smaller than the requested tile (block dim == full array dim is a
    # valid exception to the 128-lane rule; if hw is not a 128-multiple the
    # last-block stores are masked — acceptable for a one-block grid).
    if hw <= tile_hw:
        tile = hw
        n_tiles = 1
    else:
        tile = max(128, (tile_hw // 128) * 128)
        n_tiles = pl.cdiv(hw, tile)

    # Spatial-tile axis first: it has many blocks, so the v7x 2-TensorCore
    # split stays balanced even for B == 1 or odd B.  Both axes independent.
    grid = (n_tiles, B)

    kernel = functools.partial(_mlp_kernel, approximate_gelu=approximate_gelu)

    out = pl.pallas_call(
        kernel,
        out_shape=jax.ShapeDtypeStruct((B, C_out, hw), out_dtype),
        grid_spec=pltpu.PrefetchScalarGridSpec(
            num_scalar_prefetch=0,
            grid=grid,
            in_specs=[
                # batch dim squeezed (None), channels full, spatial tiled.
                pl.BlockSpec((None, C_in, tile), lambda i, b: (b, 0, i)),
                # weights / biases: grid-invariant, fetched once.
                pl.BlockSpec((C_hidden, C_in), lambda i, b: (0, 0)),
                pl.BlockSpec((C_hidden, 1), lambda i, b: (0, 0)),
                pl.BlockSpec((C_out, C_hidden), lambda i, b: (0, 0)),
                pl.BlockSpec((C_out, 1), lambda i, b: (0, 0)),
            ],
            out_specs=pl.BlockSpec((None, C_out, tile), lambda i, b: (b, 0, i)),
        ),
        compiler_params=pltpu.CompilerParams(
            # Both grid axes are fully independent -> shardable across the two
            # TensorCores on v7x; harmless on single-TC v5e/v6e.
            dimension_semantics=("parallel", "parallel"),
            # Per-step footprint is a few MiB even at 8192-lane tiles, so the
            # scoped VMEM default (16/32 MiB) is ample on every generation.
        ),
    )(x_cm, w1_m, b1_m, w2_m, b2_m)

    # (B, C_out, H*W) -> NCHW: contiguous reshape, free.
    return out.reshape(B, C_out, H, W)


def mlp_reference(x_nchw, w1, b1, w2, b2):
    """Pure-JAX f32 reference matching the PyTorch forward (1x1 convs + erf GELU)."""
    B, C_in, H, W = x_nchw.shape
    C_hidden = w1.shape[0]
    C_out = w2.shape[0]
    x = x_nchw.reshape(B, C_in, H * W).astype(jnp.float32)
    w1_m = w1.reshape(C_hidden, C_in).astype(jnp.float32)
    w2_m = w2.reshape(C_out, C_hidden).astype(jnp.float32)
    h = jnp.einsum("oi,bit->bot", w1_m, x,
                   precision=jax.lax.Precision.HIGHEST) + b1.reshape(1, C_hidden, 1)
    g = _gelu(h, approximate=False)
    o = jnp.einsum("oh,bht->bot", w2_m, g,
                   precision=jax.lax.Precision.HIGHEST) + b2.reshape(1, C_out, 1)
    return o.reshape(B, C_out, H, W).astype(x_nchw.dtype)


if __name__ == "__main__":
    # Small shapes consistent with the module: NCHW input, n_dim=2.
    B, C_in, H, W = 2, 4, 16, 16
    C_hidden, C_out = 32, 4

    key = jax.random.PRNGKey(0)
    kx, kw1, kw2 = jax.random.split(key, 3)

    x = jax.random.normal(kx, (B, C_in, H, W), dtype=jnp.float32)

    # Deterministic parameter init mirroring _init_weights: normal(std=0.02),
    # zero biases.
    w1 = 0.02 * jax.random.normal(kw1, (C_hidden, C_in, 1, 1), dtype=jnp.float32)
    b1 = jnp.zeros((C_hidden,), dtype=jnp.float32)
    w2 = 0.02 * jax.random.normal(kw2, (C_out, C_hidden, 1, 1), dtype=jnp.float32)
    b2 = jnp.zeros((C_out,), dtype=jnp.float32)

    out = jax.block_until_ready(mlp_pallas(x, w1, b1, w2, b2))
    assert out.shape == (B, C_out, H, W)
    assert out.dtype == x.dtype

    # Compare against the true f32 reference of the PyTorch module so the
    # bf16-MXU deviation is actually bounded (not hidden behind a rounded
    # reference).  bf16 operands with f32 accumulation at these magnitudes
    # stay well inside the tolerance below.
    ref = mlp_reference(x, w1, b1, w2, b2)
    max_err = float(jnp.max(jnp.abs(out.astype(jnp.float32) -
                                    ref.astype(jnp.float32))))
    assert jnp.allclose(out, ref, atol=2e-3, rtol=2e-2), max_err

    print("KERNEL_OK")
</pallas_src>

<mosaic_0001>
module attributes {stable_mosaic.version = 11 : i64} {
  func.func @_mlp_kernel(%arg0: i32, %arg1: i32, %arg2: memref<1x4x256xf32, #tpu.memory_space<vmem>>, %arg3: memref<32x4xbf16, #tpu.memory_space<vmem>>, %arg4: memref<32x1xf32, #tpu.memory_space<vmem>>, %arg5: memref<4x32xbf16, #tpu.memory_space<vmem>>, %arg6: memref<4x1xf32, #tpu.memory_space<vmem>>, %arg7: memref<1x4x256xf32, #tpu.memory_space<vmem>>) attributes {dimension_semantics = [#tpu.dimension_semantics<parallel>, #tpu.dimension_semantics<parallel>], iteration_bounds = array<i64: 1, 2>, scalar_prefetch = 0 : i64, scratch_operands = 0 : i64, tpu.core_type = #tpu.core_type<tc>, window_params = [{transform_indices = @transform_0, window_bounds = array<i64: 1, 4, 256>}, {pipeline_mode = #tpu.pipeline_mode<synchronous>, transform_indices = @transform_1, window_bounds = array<i64: 32, 4>}, {pipeline_mode = #tpu.pipeline_mode<synchronous>, transform_indices = @transform_2, window_bounds = array<i64: 32, 1>}, {pipeline_mode = #tpu.pipeline_mode<synchronous>, transform_indices = @transform_3, window_bounds = array<i64: 4, 32>}, {pipeline_mode = #tpu.pipeline_mode<synchronous>, transform_indices = @transform_4, window_bounds = array<i64: 4, 1>}, {transform_indices = @transform_5, window_bounds = array<i64: 1, 4, 256>}]} {
    %c0 = arith.constant 0 : index
    %c0_0 = arith.constant 0 : index
    %c0_1 = arith.constant 0 : index
    %0 = vector.load %arg2[%c0, %c0_0, %c0_1] : memref<1x4x256xf32, #tpu.memory_space<vmem>>, vector<1x4x256xf32>
    %1 = vector.shape_cast %0 : vector<1x4x256xf32> to vector<4x256xf32>
    %2 = arith.truncf %1 : vector<4x256xf32> to vector<4x256xbf16>
    %c0_2 = arith.constant 0 : index
    %c0_3 = arith.constant 0 : index
    %3 = vector.load %arg3[%c0_2, %c0_3] : memref<32x4xbf16, #tpu.memory_space<vmem>>, vector<32x4xbf16>
    %cst = arith.constant dense<0.000000e+00> : vector<32x256xf32>
    %4 = tpu.matmul %3, %2, %cst {dimension_numbers = #tpu.dot_dimension_numbers<[1], [0], [0], [1], [0, 0, 1, 1], [], []>} : vector<32x4xbf16>, vector<4x256xbf16>, vector<32x256xf32> -> vector<32x256xf32>
    %c0_4 = arith.constant 0 : index
    %c0_5 = arith.constant 0 : index
    %5 = vector.load %arg4[%c0_4, %c0_5] : memref<32x1xf32, #tpu.memory_space<vmem>>, vector<32x1xf32>
    %6 = vector.broadcast %5 : vector<32x1xf32> to vector<32x256xf32>
    %7 = arith.addf %4, %6 : vector<32x256xf32>
    %cst_6 = arith.constant 5.000000e-01 : f32
    %8 = vector.broadcast %cst_6 : f32 to vector<32x256xf32>
    %9 = arith.mulf %8, %7 : vector<32x256xf32>
    %cst_7 = arith.constant 0.707106769 : f32
    %10 = vector.broadcast %cst_7 : f32 to vector<32x256xf32>
    %11 = arith.mulf %7, %10 : vector<32x256xf32>
    %12 = math.erf %11 : vector<32x256xf32>
    %cst_8 = arith.constant 1.000000e+00 : f32
    %13 = vector.broadcast %cst_8 : f32 to vector<32x256xf32>
    %14 = arith.addf %13, %12 : vector<32x256xf32>
    %15 = arith.mulf %9, %14 : vector<32x256xf32>
    %16 = arith.truncf %15 : vector<32x256xf32> to vector<32x256xbf16>
    %c0_9 = arith.constant 0 : index
    %c0_10 = arith.constant 0 : index
    %17 = vector.load %arg5[%c0_9, %c0_10] : memref<4x32xbf16, #tpu.memory_space<vmem>>, vector<4x32xbf16>
    %cst_11 = arith.constant dense<0.000000e+00> : vector<4x256xf32>
    %18 = tpu.matmul %17, %16, %cst_11 {dimension_numbers = #tpu.dot_dimension_numbers<[1], [0], [0], [1], [0, 0, 1, 1], [], []>} : vector<4x32xbf16>, vector<32x256xbf16>, vector<4x256xf32> -> vector<4x256xf32>
    %c0_12 = arith.constant 0 : index
    %c0_13 = arith.constant 0 : index
    %19 = vector.load %arg6[%c0_12, %c0_13] : memref<4x1xf32, #tpu.memory_space<vmem>>, vector<4x1xf32>
    %20 = vector.broadcast %19 : vector<4x1xf32> to vector<4x256xf32>
    %21 = arith.addf %18, %20 : vector<4x256xf32>
    %c0_14 = arith.constant 0 : index
    %c0_15 = arith.constant 0 : index
    %c0_16 = arith.constant 0 : index
    %22 = vector.load %arg7[%c0_14, %c0_15, %c0_16] : memref<1x4x256xf32, #tpu.memory_space<vmem>>, vector<1x4x256xf32>
    %23 = vector.shape_cast %22 : vector<1x4x256xf32> to vector<4x256xf32>
    %24 = vector.shape_cast %21 : vector<4x256xf32> to vector<1x4x256xf32>
    tpu.vector_store %arg7[%c0_14, %c0_15, %c0_16], %24 {strides = array<i32>} : memref<1x4x256xf32, #tpu.memory_space<vmem>>, vector<1x4x256xf32>,
    return
  }
  func.func @transform_0(%arg0: i32, %arg1: i32) -> (i32, i32, i32) {
    %c0_i32 = arith.constant 0 : i32
    %c0_i32_0 = arith.constant 0 : i32
    return %arg1, %c0_i32, %arg0 : i32, i32, i32
  }
  func.func @transform_1(%arg0: i32, %arg1: i32) -> (i32, i32) {
    %c0_i32 = arith.constant 0 : i32
    %c0_i32_0 = arith.constant 0 : i32
    %c0_i32_1 = arith.constant 0 : i32
    return %c0_i32, %c0_i32_0 : i32, i32
  }
  func.func @transform_2(%arg0: i32, %arg1: i32) -> (i32, i32) {
    %c0_i32 = arith.constant 0 : i32
    %c0_i32_0 = arith.constant 0 : i32
    %c0_i32_1 = arith.constant 0 : i32
    return %c0_i32, %c0_i32_0 : i32, i32
  }
  func.func @transform_3(%arg0: i32, %arg1: i32) -> (i32, i32) {
    %c0_i32 = arith.constant 0 : i32
    %c0_i32_0 = arith.constant 0 : i32
    %c0_i32_1 = arith.constant 0 : i32
    return %c0_i32, %c0_i32_0 : i32, i32
  }
  func.func @transform_4(%arg0: i32, %arg1: i32) -> (i32, i32) {
    %c0_i32 = arith.constant 0 : i32
    %c0_i32_0 = arith.constant 0 : i32
    %c0_i32_1 = arith.constant 0 : i32
    return %c0_i32, %c0_i32_0 : i32, i32
  }
  func.func @transform_5(%arg0: i32, %arg1: i32) -> (i32, i32, i32) {
    %c0_i32 = arith.constant 0 : i32
    %c0_i32_0 = arith.constant 0 : i32
    return %arg1, %c0_i32, %arg0 : i32, i32, i32
  }
}

</mosaic_0001>

<bundles_post_ra>
// kernel: tpu_custom_call.1
= control target key start
LH: loop header
LB: loop body
LE: loop exit
PB: predicated region body
PF: predicated region fallthrough
CT: control target
= control target key end

     0   :  { %10 = vsyncpa [#allocation3], 0  ;;  %s897_s0 = inlined_call_operand.vmem [shape: f32[2,4,256], index: 0, kind: input, shape index: {}]   ;;  %s898_s1 = inlined_call_operand.vmem [shape: bf16[32,4], index: 1, kind: input, shape index: {}]   ;;  %s899_s2 = inlined_call_operand.vmem [shape: f32[32,1], index: 2, kind: input, shape index: {}]   ;;  %s900_s3 = inlined_call_operand.vmem [shape: bf16[4,32], index: 3, kind: input, shape index: {}]   ;;  %s901_s4 = inlined_call_operand.vmem [shape: f32[4,1], index: 4, kind: input, shape index: {}]   ;;  %s902_s5 = inlined_call_operand.hbm [shape: f32[2,4,256], index: 5, kind: output, shape index: {}]  }
   0x1   :  { %12 = vsyncpa [#allocation3 + $0x1], 0  ;;  %s768_s18 = smov 0   ;;  %s770_s19 = smov 0  }
   0x2   :  { %s772_s20 = smov 0   ;;  %s774_s21 = smov 0  }
   0x3   :  { %s776_s22 = smov 0   ;;  %s778_s23 = smov 0  }
   0x4 LB: > { %s560_s24 = sadd.s32 4294967295, %s734_s23   ;;  %s561_s25 = sadd.s32 4294967294, %s734_s23   ;;  %s734_s23 = sphi %s778_s23, %s18_s23   ;;  %s730_s22 = sphi %s776_s22, %s909_s22   ;;  %s726_s21 = sphi %s774_s21, %s908_s21   ;;  %s722_s20 = sphi %s772_s20, %s907_s20   ;;  %s718_s19 = sphi %s770_s19, %s906_s19   ;;  %s714_s18 = sphi %s768_s18, %s905_s18  }
   0x5   : > { %s27_s26 = sadd.s32 1, %s730_s22  ;;  %s151_s27 = sadd.s32 1, %s722_s20 }
   0x6   : > { %p28_p0 = scmp.ge.s32.totalorder %s27_s26, 2  ;;  %p161_p1 = scmp.ne.s32.totalorder %s722_s20, %s718_s19 }
   0x7   : > { %p162_p2 = scmp.eq.s32.totalorder %s560_s24, 1  ;;  %p167_p3 = scmp.ne.s32.totalorder %s718_s19, %s714_s18 }
   0x8   : > { %s911_s26 = smov (%p28_p0, %s27_s26), 0  ;;  %p168_p5 = scmp.eq.s32.totalorder %s561_s25, 1 }
   0x9   : > { %p808_p4 = por %p162_p2, %p161_p1  ;;  %s146_s29 = ssub.s32 %s730_s22, %s911_s26 }
   0xa   : > { %p564_p6 = scmp.ge.s32.totalorder %s734_s23, 1  ;;  %p149_p7 = scmp.eq.s32.totalorder %s146_s29, 0 }
   0xb   : > { %p815_p8 = por %p168_p5, %p167_p3  ;;  %p211_p9 = scmp.lt.s32.totalorder %s734_s23, 3 }
   0xc   : > { %s821_s6 = scalar_select %p149_p7, %s722_s20, %s151_s27  }
   0xd   : > { %p212_p10 = pnand %p564_p6, %p211_p9 }
   0xe   : > { %p244_p11 = scmp.lt.s32.totalorder (!%p212_p10), %s726_s21, 1  ;;  %s240_s13 = sand.u32 (!%p212_p10), 1, %s718_s19  }
   0xf   : > { %215 = sbr.rel (%p212_p10) target bundleno = 484 (0x1e4), region = 40  ;;  %s565_s14 = sshll.u32 (!%p212_p10), %s240_s13, 3 }
  0x10   : > { %s580_s15 = sshll.u32 (!%p212_p10), %s726_s21, 7  ;;  %s242_s16 = scalar_lea.vmem (!%p212_p10), [#allocation2], %s565_s14 }
  0x11   : > { %s484_s17 = sshll.u32 (!%p212_p10), %s242_s16, 4  ;;  %s857_s27 = scalar_lea.hbm (!%p212_p10), %s902_s5, %s580_s15  ;;  %s485_s17 = int_to_ptr.vmem [resolvable:$true] %s484_s17 }
  0x12   : > { %s468_s29 = scalar_lea.sflag (!%p212_p10), [#allocation3], %s240_s13 }
  0x14   : > { %v736_v0 = vmov 0   ;;  %s245_s7 = scalar_select %p244_p11, %s726_s21, 1  ;;  %v265_v1 = vld [vmem:[%s899_s2] sm:$0xff]  ;;  %v267_v2 = vld [vmem:[%s899_s2 + $0x10] sm:$0xff]  ;;  %v266_v3 = vld [vmem:[%s899_s2 + $0x8] sm:$0xff]  ;;  %vm306_vm0 = vcmask 1041408  }
  0x15   : > { %345 = vmatprep.mubr.bf16.mxu0 %v736_v0  ;;  %638 = vset.pattern.permute.xlu1 %v736_v0  ;;  %v268_v4 = vld [vmem:[%s899_s2 + $0x18] sm:$0xff]  ;;  %v411_v8 = vld [vmem:[%s901_s4] sm:$0xf]  ;;  %vm299_vm1 = vcmask 31744   ;;  %v641_v12 = vld [vmem:[%s898_s1 + $0x8] sm:$0xff]   ;;  %vm417_vm2 = vcmask 261120  }
  0x16   : > { %637 = vset.pattern.permute.xlu0 %v736_v0  ;;  %453 = vmatprep.mubr.bf16.mxu1 %v736_v0  ;;  %s579_s12 = sshll.u32 %s245_s7, 3  ;;  %v640_v11 = vld [vmem:[%s898_s1] sm:$0xff]   ;;  %s658_s7 = scalar_lea.vmem %s485_s17, 128 }
  0x17   : > { %271 = vperm.xlu1 %638, %v265_v1   ;;  %281 = vperm.xlu0 %637, %v267_v2   ;;  %s251_s25 = scalar_lea.vmem %s897_s0, %s579_s12  ;;  %p659_p12 = scmp.ne.s32.totalorder %s485_s17, %s658_s7 }
  0x18   : > { %v255_v5 = vld [vmem:[%s251_s25] sm:$0xff]  ;;  %s737_s21 = smov [#allocation2]  }
  0x19   : > { %v257_v6 = vcombine.high %v255_v5, %v255_v5  ;;  %v259_v7 = vpack.c.bf16 %v255_v5, %v255_v5  ;;  %p660_p13 = pnand %p659_p12, %p808_p4  ;;  %s662_s8 = sshll.u32 %s737_s21, 4  ;;  %s663_s8 = int_to_ptr.vmem [resolvable:$false] %s662_s8 }
  0x1a   : > { %s664_s9 = scalar_lea.vmem %s663_s8, 256  ;;  %p665_p1 = scmp.lt.s32.totalorder %s485_s17, %s663_s8 }
  0x1b   : > { %276 = vperm.xlu1 %638, %v266_v3   ;;  %286 = vperm.xlu0 %637, %v268_v4   ;;  %v260_v9 = vpack.c.bf16 %v257_v6, %v257_v6  ;;  %v308_v10 = vsel %vm306_vm0, %v259_v7, 0  ;;  %p661_p0 = pneg %p660_p13  ;;  %p666_p2 = scmp.lt.s32.totalorder %s664_s9, %s658_s7 }
  0x1d   : > { %570 = vmatprep.subr.msk.bf16.mxu0 %vm306_vm0, %v260_v9  ;;  %p667_p3 = por %p666_p2, %p665_p1 }
  0x1e   : > { %328 = vmatpush1.bf16.msra.mxu0 %v308_v10 }
  0x1f   : > { %414 = vperm.xlu0 %637, %v411_v8   ;;  %p668_p5 = pnand %p667_p3, %p661_p0 }
  0x21   : > { %571 = vmatmul.mubr.msk.bf16.vlgmr.msra.gmra.mxu0 %vm299_vm1, %v640_v11 }
  0x22   : > { %355 = vmatprep.mubr.bf16.mxu0 %v736_v0 }
  0x29   : > { %572 = vmatmul.mubr.msk.bf16.gmra.mxu0 %vm299_vm1, %v641_v12 }
  0x92   : > { %v272_v13 = vpop.permute.xlu1 %271  ;;  %v282_v17 = vpop.permute.xlu0 %281 }
  0x96   : > { %v277_v19 = vpop.permute.xlu1 %276  ;;  %v287_v30 = vpop.permute.xlu0 %286 }
  0xe1   : > { %v347_v14 = vpop.f32.mrf.mxu0 }
  0xe2   : > { %v348_v29 = vadd.f32 %v347_v14, %v272_v13 }
  0xe3   : > { %v349_v15 = vpop.f32.mrf.mxu0 }
  0xe4   : > { %v350_v18 = vadd.f32 %v349_v15, %v272_v13  ;;  %v374_v39 = vmul.f32 0.70710677, %v348_v29  ;;  %v366_v7 = vmul.f32 0.5, %v348_v29  ;;  %v410_v13 = vld [vmem:[%s900_s3] sm:$0x3]  ;;  %v415_v15 = vpop.permute.xlu0 %414 }
  0xe5   : > { %v351_v16 = vpop.f32.mrf.mxu0 }
  0xe6   : > { %v375_v23 = vmul.f32 0.70710677, %v350_v18  ;;  %v352_v25 = vadd.f32 %v351_v16, %v277_v19  ;;  %v367_v62 = vmul.f32 0.5, %v350_v18 }
  0xe7   : > { %v353_v20 = vpop.f32.mrf.mxu0 }
  0xe8   : > { %v354_v21 = vadd.f32 %v353_v20, %v277_v19  ;;  %642 = verf.f32 %v375_v23  ;;  %v376_v35 = vmul.f32 0.70710677, %v352_v25  ;;  %v368_v3 = vmul.f32 0.5, %v352_v25 }
  0xe9   : > { %v357_v22 = vpop.f32.mrf.mxu0 }
  0xea   : > { %v358_v24 = vadd.f32 %v357_v22, %v282_v17  ;;  %v377_v26 = vmul.f32 0.70710677, %v354_v21  ;;  %v369_v51 = vmul.f32 0.5, %v354_v21 }
  0xeb   : > { %v359_v27 = vpop.f32.mrf.mxu0 }
  0xec   : > { %v360_v28 = vadd.f32 %v359_v27, %v282_v17  ;;  %v378_v31 = vmul.f32 0.70710677, %v358_v24  ;;  %644 = verf.f32 %v377_v26  ;;  %v370_v60 = vmul.f32 0.5, %v358_v24 }
  0xed   : > { %v361_v32 = vpop.f32.mrf.mxu0 }
  0xee   : > { %v379_v33 = vmul.f32 0.70710677, %v360_v28  ;;  %v362_v34 = vadd.f32 %v361_v32, %v287_v30  ;;  %v371_v56 = vmul.f32 0.5, %v360_v28 }
  0xef   : > { %v363_v36 = vpop.f32.mrf.mxu0 }
  0xf0   : > { %646 = verf.f32 %v379_v33  ;;  %v380_v37 = vmul.f32 0.70710677, %v362_v34  ;;  %v364_v38 = vadd.f32 %v363_v36, %v287_v30  ;;  %v372_v52 = vmul.f32 0.5, %v362_v34 }
  0xf1   : > { %648 = verf.f32 %v378_v31 }
  0xf2   : > { %650 = verf.f32 %v380_v37  ;;  %v381_v40 = vmul.f32 0.70710677, %v364_v38  ;;  %v373_v57 = vmul.f32 0.5, %v364_v38 }
  0xf3   : > { %652 = verf.f32 %v376_v35 }
  0xf4   : > { %654 = verf.f32 %v381_v40 }
  0xf5   : > { %656 = verf.f32 %v374_v39  ;;  %v643_v41 = vpop.eup %642 }
  0xf6   : > { %v391_v55 = vadd.f32 1.0, %v643_v41 }
  0xf8   : > { %v399_v5 = vmul.f32 %v391_v55, %v367_v62 }
  0xf9   : > { %v645_v42 = vpop.eup %644 }
  0xfa   : > { %v393_v47 = vadd.f32 1.0, %v645_v42 }
  0xfc   : > { %v401_v63 = vmul.f32 %v393_v47, %v369_v51 }
  0xfd   : > { %v647_v43 = vpop.eup %646 }
  0xfe   : > { %v649_v44 = vpop.eup %648  ;;  %v395_v48 = vadd.f32 1.0, %v647_v43  ;;  %v407_v10 = vpack.c.bf16 %v401_v63, %v399_v5 }
  0xff   : > { %v651_v45 = vpop.eup %650  ;;  %v394_v53 = vadd.f32 1.0, %v649_v44 }
 0x100   : > { %v653_v46 = vpop.eup %652  ;;  %v396_v49 = vadd.f32 1.0, %v651_v45  ;;  %v403_v0 = vmul.f32 %v395_v48, %v371_v56 }
 0x101   : > { %v655_v50 = vpop.eup %654  ;;  %v392_v59 = vadd.f32 1.0, %v653_v46  ;;  %v402_v4 = vmul.f32 %v394_v53, %v370_v60 }
 0x102   : > { %v657_v54 = vpop.eup %656  ;;  %v397_v58 = vadd.f32 1.0, %v655_v50  ;;  %v404_v61 = vmul.f32 %v396_v49, %v372_v52 }
 0x103   : > { %v390_v2 = vadd.f32 1.0, %v657_v54  ;;  %v400_v8 = vmul.f32 %v392_v59, %v368_v3 }
 0x104   : > { %v405_v1 = vmul.f32 %v397_v58, %v373_v57  ;;  %v408_v9 = vpack.c.bf16 %v404_v61, %v402_v4 }
 0x105   : > { %v398_v11 = vmul.f32 %v390_v2, %v366_v7 }
 0x106   : > { %v409_v6 = vpack.c.bf16 %v405_v1, %v403_v0 }
 0x107   : > { %v406_v12 = vpack.c.bf16 %v400_v8, %v398_v11 }
 0x108   : > { %433 = vmatprep.subr.bf16.mxu1 %v409_v6 }
 0x109   : > { %434 = vmatpush1.bf16.msra.mxu1 %v408_v9 }
 0x10a   : > { %435 = vmatprep.subr.bf16.mxu1 %v407_v10 }
 0x10d   : > { %436 = vmatpush1.bf16.msra.mxu1 %v406_v12 }
 0x110   : > { %573 = vmatmul.mubr.msk.bf16.vlgmr.msra.gmra.mxu1 %vm417_vm2, %v410_v13 }
 0x1d0   : > { %v455_v14 = vpop.f32.mrf.mxu1 }
 0x1d1   : > { %v456_v17 = vadd.f32 %v455_v14, %v415_v15 }
 0x1d2   : > { %v457_v16 = vpop.f32.mrf.mxu1 }
 0x1d3   : > { %v458_v18 = vadd.f32 %v457_v16, %v415_v15 }
 0x1d4   : > { %v459_v19 = vpop.f32.mrf.mxu1 }
 0x1d5   : > { %v464_v20 = vcombine.low %v456_v17, %v458_v18 }
 0x1d6   : > { %v460_v21 = vpop.f32.mrf.mxu1 }
 0x1d7   : > { %466 = vst [vmem:[%s242_s16] sm:$0xff] %v464_v20 }
 0x1d8   : > { %671 = shalt.err (!%p668_p5)
}
 0x1d9   : > { %s672_s10 = scalar_lea.hbm %s857_s27, 128  ;;  %s676_s13 = scalar_lea.hbm %s902_s5, 256 }
 0x1da   : > { %p673_p6 = scmp.ne.s32.totalorder %s857_s27, %s672_s10  ;;  %p677_p10 = scmp.lt.s32.totalorder %s857_s27, %s902_s5 }
 0x1db   : > { %p678_p11 = scmp.lt.s32.totalorder %s676_s13, %s672_s10 }
 0x1dc   : > { %p674_p7 = pnand %p673_p6, %p808_p4 }
 0x1dd   : > { %p679_p12 = por %p678_p11, %p677_p10 }
 0x1de   : > { %p675_p9 = pneg %p674_p7 }
 0x1e0   : > { %p680_p13 = pnand %p679_p12, %p675_p9 }
 0x1e2   : > { %683 = shalt.err (!%p680_p13)
}
 0x1e3   : > { %581 = dma.vmem_to_hbm [thread:$0]  (%p808_p4), %s485_s17, 128, %s857_s27, %s468_s29  }
 0x1e4 PF: > { %p587_p0 = scmp.ge.s32.totalorder %s734_s23, 2  ;;  %s496_s16 = sand.u32 1, %s714_s18  }
 0x1e5   : > { %s497_s24 = scalar_lea.sflag [#allocation3], %s496_s16 }
 0x1e6   : > { %p584_p1 = pnand %p587_p0, %p815_p8 }
 0x1e8   : > { %p585_p2 = pneg %p584_p1 }
 0x1ea   : > { %709 = dma.done.wait (%p585_p2), %s497_s24, 128  }
 0x1eb   : > { %711 = vsyncadd (%p585_p2), %s497_s24, 4294967168  ;;  %s18_s23 = sadd.s32 1, %s734_s23   ;;  %s905_s18 = smov %s718_s19 }
 0x1ec   : > { %p15_p3 = scmp.ge.s32.totalorder %s18_s23, 4   ;;  %s906_s19 = smov %s722_s20 }
 0x1ed   : > { %s907_s20 = smov %s821_s6  ;;  %s908_s21 = smov %s730_s22 }
 0x1ee   : > { %s909_s22 = smov %s911_s26  ;;  %17 = sbr.rel (!%p15_p3) target bundleno = 4 (0x4), region = 75 }
 0x1f3   :  { %502 = vsyncpa [#allocation3], 1 }
 0x1f4   :  { %504 = vsyncpa [#allocation3 + $0x1], 1 }

</bundles_post_ra>
